<compile_context>
chip_gen: v7x
topology: tpu7x:2x2x1
jax: 0.10.0
libtpu: 0.0.40
codegen_flags: <defaults>
</compile_context>

<pallas_src>
import functools

import jax
import jax.numpy as jnp
from jax import lax
from jax.experimental import pallas as pl
from jax.experimental.pallas import tpu as pltpu


def _round_up(x, m):
    return ((x + m - 1) // m) * m


def _proxy_nca_kernel(x_ref, t_ref, pt_ref, loss_ref, corr_ref, *,
                      n_rows, n_classes, tile_b, on_val, off_val, sum_t):
    pid = pl.program_id(0)

    X = x_ref[...]                                        # (tb, Ep) bf16
    labels = t_ref[...]                                   # (tb, 1) int32

    # Row L2-norm in f32 (matches reference), cast to bf16 for the MXU.
    xf = X.astype(jnp.float32)
    xn = (xf * lax.rsqrt(jnp.sum(xf * xf, axis=1, keepdims=True) + 1e-12)
          ).astype(jnp.bfloat16)

    # D = Xn @ PnT with PnT already (E_pad, C_pad): MXU-native (K,N) layout,
    # bf16 inputs, f32 accumulation.
    D = lax.dot_general(xn, pt_ref[...],
                        dimension_numbers=(((1,), (0,)), ((), ())),
                        preferred_element_type=jnp.float32)   # (tb, Cp) f32

    tb, cpad = D.shape
    class_ids = lax.broadcasted_iota(jnp.int32, (tb, cpad), 1)   # reused
    valid_c = class_ids < n_classes                              # pad columns
    onehot = class_ids == labels                                 # (tb, Cp)

    row_ids = pid * tile_b + lax.broadcasted_iota(jnp.int32, (tb, 1), 0)
    valid_r = row_ids < n_rows                                   # pad rows

    BIG = 1e30
    # Per-row scalars only; never materialize log_softmax / Tb / their product.
    D_lo = jnp.where(valid_c, D, BIG)
    minD = jnp.min(D_lo, axis=-1, keepdims=True)                       # (tb,1)
    sum_exp = jnp.sum(jnp.exp(minD - D_lo), axis=-1, keepdims=True)    # (tb,1)
    sumD = jnp.sum(jnp.where(valid_c, D, 0.0), axis=-1, keepdims=True)
    d_lab = jnp.sum(jnp.where(onehot, D, 0.0), axis=-1, keepdims=True)

    # loss_row = sum_c(-Tb*log_softmax(-D))
    #          = off*sumD + (on-off)*D_label + S_T * logsumexp(-D)
    #   with logsumexp(-D) = log(sum_exp) - minD,  S_T = on + off*(C-1).
    loss_rows = (off_val * sumD + (on_val - off_val) * d_lab
                 + sum_t * (jnp.log(sum_exp) - minD))                  # (tb,1)
    loss_partial = jnp.sum(jnp.where(valid_r, loss_rows, 0.0),
                           keepdims=True)                              # (1,1)

    # argmax over classes (first max index, matching torch.max tie-break).
    D_hi = jnp.where(valid_c, D, -BIG)
    maxD = jnp.max(D_hi, axis=-1, keepdims=True)
    amax = jnp.min(jnp.where(D_hi == maxD, class_ids, cpad),
                   axis=-1, keepdims=True)                             # (tb,1)
    corr_rows = jnp.logical_and(amax == labels, valid_r)
    corr_partial = jnp.sum(jnp.where(corr_rows, 1.0, 0.0), keepdims=True)

    # Lane/sublane-dense per-tile partial outputs (no cross-step revisit).
    loss_ref[...] = jnp.broadcast_to(loss_partial, loss_ref.shape)
    corr_ref[...] = jnp.broadcast_to(corr_partial, corr_ref.shape)


def proxy_nca_forward(X, proxies, labels, *, batch_size, smoothing_const=0.3,
                      tile_b=None):
    """Returns (loss_mean, corr) as scalar float32 values."""
    B, E = X.shape
    C = proxies.shape[0]

    # Lane-dense padding targets.
    E_pad = _round_up(E, 128)
    C_pad = _round_up(C, 128)

    if tile_b is None:
        try:
            kind = jax.devices()[0].device_kind.lower()
        except Exception:  # pragma: no cover
            kind = ""
        default_tile = 128 if ("v5e" in kind or "v5 lite" in kind) else 256
        tile_b = default_tile if B >= default_tile else _round_up(B, 8)
    tile_b = _round_up(tile_b, 8)
    B_pad = _round_up(B, tile_b)
    num_tiles = B_pad // tile_b

    # --- wrapper-side prep (cast fused with pad; pad skipped when aligned) ---
    Xb = X.astype(jnp.bfloat16)
    if (B_pad != B) or (E_pad != E):
        Xb = jnp.zeros((B_pad, E_pad), jnp.bfloat16).at[:B, :E].set(Xb)

    Tl = labels.astype(jnp.int32).reshape(B, 1)
    if B_pad != B:
        # Padded rows get label -1 (never matches); they are also masked
        # out of the loss / corr inside the kernel.
        Tl = jnp.full((B_pad, 1), -1, jnp.int32).at[:B].set(Tl)

    # Normalize proxies once (tiny XLA op), pre-transpose to (E, C), bf16.
    Pf = proxies.astype(jnp.float32)
    Pn = Pf * lax.rsqrt(jnp.sum(Pf * Pf, axis=1, keepdims=True) + 1e-12)
    PnT = Pn.T.astype(jnp.bfloat16)                             # (E, C)
    if (E_pad != E) or (C_pad != C):
        PnT = jnp.zeros((E_pad, C_pad), jnp.bfloat16).at[:E, :C].set(PnT)

    # binarize() constants (default smoothing_const=0.3, as in the reference).
    on_val = -(1.0 - smoothing_const) * (10.0 / C)
    off_val = smoothing_const / (C - 1)
    sum_t = on_val + off_val * (C - 1)

    kernel = functools.partial(
        _proxy_nca_kernel,
        n_rows=B, n_classes=C, tile_b=tile_b,
        on_val=float(on_val), off_val=float(off_val), sum_t=float(sum_t),
    )

    # Only raise the scoped-VMEM limit when the estimated footprint needs it.
    est_vmem = (2 * tile_b * E_pad * 2          # X tile (bf16, double-buffered)
                + 2 * E_pad * C_pad * 2         # resident proxies (bf16, 2 buf)
                + 2 * tile_b * 4                # labels
                + 8 * tile_b * C_pad * 4        # (tile_b, C_pad) f32 temps
                + (2 << 20))                    # misc headroom
    compiler_kwargs = dict(dimension_semantics=("parallel",))
    if est_vmem > (30 << 20):
        try:
            phys = pltpu.get_tpu_info().vmem_capacity_bytes
        except Exception:  # pragma: no cover
            phys = 64 << 20
        compiler_kwargs["vmem_limit_bytes"] = int(min(est_vmem,
                                                      int(phys * 0.9)))

    loss_tiles, corr_tiles = pl.pallas_call(
        kernel,
        out_shape=(
            jax.ShapeDtypeStruct((num_tiles, 8, 128), jnp.float32),
            jax.ShapeDtypeStruct((num_tiles, 8, 128), jnp.float32),
        ),
        grid_spec=pltpu.PrefetchScalarGridSpec(
            num_scalar_prefetch=0,
            grid=(num_tiles,),
            in_specs=[
                pl.BlockSpec((tile_b, E_pad), lambda i: (i, 0)),    # X tile
                pl.BlockSpec((tile_b, 1), lambda i: (i, 0)),        # labels
                pl.BlockSpec((E_pad, C_pad), lambda i: (0, 0)),     # Pn^T res.
            ],
            out_specs=(
                pl.BlockSpec((1, 8, 128), lambda i: (i, 0, 0)),     # loss part
                pl.BlockSpec((1, 8, 128), lambda i: (i, 0, 0)),     # corr part
            ),
        ),
        compiler_params=pltpu.CompilerParams(**compiler_kwargs),
    )(Xb, Tl, PnT)

    loss = jnp.sum(loss_tiles[:, 0, 0]) / float(B)
    corr = jnp.sum(corr_tiles[:, 0, 0]) / float(batch_size)
    return loss, corr


def _reference(X, proxies, labels, batch_size, smoothing_const=0.3,
               mirror_bf16=False):
    """Pure-JAX reference. mirror_bf16=True mirrors the kernel's bf16 matmul."""
    Xf = X.astype(jnp.float32)
    Pf = proxies.astype(jnp.float32)
    if mirror_bf16:
        Xf = Xf.astype(jnp.bfloat16).astype(jnp.float32)
    C = Pf.shape[0]
    xn = Xf * lax.rsqrt(jnp.sum(Xf * Xf, axis=1, keepdims=True) + 1e-12)
    pn = Pf * lax.rsqrt(jnp.sum(Pf * Pf, axis=1, keepdims=True) + 1e-12)
    if mirror_bf16:
        xn = xn.astype(jnp.bfloat16)
        pn = pn.astype(jnp.bfloat16)
    D = jnp.dot(xn, pn.T, preferred_element_type=jnp.float32)
    onehot = jax.nn.one_hot(labels, C, dtype=jnp.float32)
    Tb = jnp.where(onehot > 0,
                   -(1.0 - smoothing_const) * (10.0 / C),
                   smoothing_const / (C - 1))
    log_sm = jax.nn.log_softmax(-D, axis=-1)
    loss = jnp.mean(jnp.sum(-Tb * log_sm, axis=-1))
    corr = jnp.sum((jnp.argmax(D, axis=-1) == labels).astype(jnp.float32)
                   ) / batch_size
    return loss, corr


if __name__ == "__main__":
    # Small shapes consistent with the module's forward.
    B, E, C = 8, 32, 8
    batch_size = B

    key = jax.random.PRNGKey(0)
    kx, kp, kt = jax.random.split(key, 3)
    proxies = jax.random.normal(kp, (C, E), dtype=jnp.float32) / 8.0  # randn/8
    X = jax.random.normal(kx, (B, E), dtype=jnp.float32)
    labels = jax.random.randint(kt, (B,), 0, C, dtype=jnp.int32)

    loss, corr = proxy_nca_forward(X, proxies, labels, batch_size=batch_size)
    loss = jax.block_until_ready(loss)
    corr = jax.block_until_ready(corr)

    rl_f32, rc_f32 = _reference(X, proxies, labels, batch_size)
    rl_b16, rc_b16 = _reference(X, proxies, labels, batch_size,
                                mirror_bf16=True)
    # Tight vs bf16-matmul reference, loose vs the exact f32 reference.
    assert jnp.allclose(loss, rl_b16, atol=2e-3, rtol=2e-3), (loss, rl_b16)
    assert jnp.allclose(loss, rl_f32, atol=3e-2, rtol=3e-2), (loss, rl_f32)
    assert jnp.allclose(corr, rc_b16, atol=1e-6), (corr, rc_b16)

    # Second check: non-aligned shapes + forced multi-tile grid to exercise the
    # padding masks and the per-tile ("parallel") partial-output path.
    B2, E2, C2 = 37, 200, 75
    k2x, k2p, k2t = jax.random.split(jax.random.PRNGKey(1), 3)
    P2 = jax.random.normal(k2p, (C2, E2), dtype=jnp.float32) / 8.0
    X2 = jax.random.normal(k2x, (B2, E2), dtype=jnp.float32)
    T2 = jax.random.randint(k2t, (B2,), 0, C2, dtype=jnp.int32)

    l2, c2 = proxy_nca_forward(X2, P2, T2, batch_size=B2, tile_b=16)
    l2 = jax.block_until_ready(l2)
    c2 = jax.block_until_ready(c2)
    rl2_f32, _ = _reference(X2, P2, T2, B2)
    rl2_b16, rc2_b16 = _reference(X2, P2, T2, B2, mirror_bf16=True)
    assert jnp.allclose(l2, rl2_b16, atol=2e-3, rtol=2e-3), (l2, rl2_b16)
    assert jnp.allclose(l2, rl2_f32, atol=3e-2, rtol=3e-2), (l2, rl2_f32)
    assert jnp.allclose(c2, rc2_b16, atol=1e-6), (c2, rc2_b16)

    print("KERNEL_OK")
</pallas_src>

<mosaic_0001>
module attributes {stable_mosaic.version = 11 : i64} {
  func.func @_proxy_nca_kernel(%arg0: i32, %arg1: memref<8x128xbf16, #tpu.memory_space<vmem>>, %arg2: memref<8x1xi32, #tpu.memory_space<vmem>>, %arg3: memref<128x128xbf16, #tpu.memory_space<vmem>>, %arg4: memref<1x8x128xf32, #tpu.memory_space<vmem>>, %arg5: memref<1x8x128xf32, #tpu.memory_space<vmem>>) attributes {dimension_semantics = [#tpu.dimension_semantics<parallel>], iteration_bounds = array<i64: 1>, scalar_prefetch = 0 : i64, scratch_operands = 0 : i64, tpu.core_type = #tpu.core_type<tc>, window_params = [{transform_indices = @transform_0, window_bounds = array<i64: 8, 128>}, {transform_indices = @transform_1, window_bounds = array<i64: 8, 1>}, {pipeline_mode = #tpu.pipeline_mode<synchronous>, transform_indices = @transform_2, window_bounds = array<i64: 128, 128>}, {transform_indices = @transform_3, window_bounds = array<i64: 1, 8, 128>}, {transform_indices = @transform_4, window_bounds = array<i64: 1, 8, 128>}]} {
    %c0 = arith.constant 0 : index
    %c0_0 = arith.constant 0 : index
    %0 = vector.load %arg1[%c0, %c0_0] : memref<8x128xbf16, #tpu.memory_space<vmem>>, vector<8x128xbf16>
    %c0_1 = arith.constant 0 : index
    %c0_2 = arith.constant 0 : index
    %1 = vector.load %arg2[%c0_1, %c0_2] : memref<8x1xi32, #tpu.memory_space<vmem>>, vector<8x1xi32>
    %2 = arith.extf %0 : vector<8x128xbf16> to vector<8x128xf32>
    %3 = arith.mulf %2, %2 : vector<8x128xf32>
    %cst = arith.constant dense<0.000000e+00> : vector<8xf32>
    %4 = vector.multi_reduction <add>, %3, %cst [1] : vector<8x128xf32> to vector<8xf32>
    %5 = vector.shape_cast %4 : vector<8xf32> to vector<8x1xf32>
    %cst_3 = arith.constant 9.99999996E-13 : f32
    %6 = vector.broadcast %cst_3 : f32 to vector<8x1xf32>
    %7 = arith.addf %5, %6 : vector<8x1xf32>
    %8 = math.rsqrt %7 : vector<8x1xf32>
    %9 = vector.broadcast %8 : vector<8x1xf32> to vector<8x128xf32>
    %10 = arith.mulf %2, %9 : vector<8x128xf32>
    %11 = arith.truncf %10 : vector<8x128xf32> to vector<8x128xbf16>
    %c0_4 = arith.constant 0 : index
    %c0_5 = arith.constant 0 : index
    %12 = vector.load %arg3[%c0_4, %c0_5] : memref<128x128xbf16, #tpu.memory_space<vmem>>, vector<128x128xbf16>
    %cst_6 = arith.constant dense<0.000000e+00> : vector<8x128xf32>
    %13 = tpu.matmul %11, %12, %cst_6 {dimension_numbers = #tpu.dot_dimension_numbers<[1], [0], [0], [1], [0, 0, 1, 1], [], []>} : vector<8x128xbf16>, vector<128x128xbf16>, vector<8x128xf32> -> vector<8x128xf32>
    %14 = tpu.iota {dimensions = array<i32: 1>} : vector<8x128xi32>
    %c8_i32 = arith.constant 8 : i32
    %15 = vector.broadcast %c8_i32 : i32 to vector<8x128xi32>
    %16 = arith.cmpi slt, %14, %15 : vector<8x128xi32>
    %17 = vector.broadcast %1 : vector<8x1xi32> to vector<8x128xi32>
    %18 = arith.cmpi eq, %14, %17 : vector<8x128xi32>
    %c8_i32_7 = arith.constant 8 : i32
    %19 = arith.muli %arg0, %c8_i32_7 : i32
    %20 = tpu.iota {dimensions = array<i32: 0>} : vector<8x1xi32>
    %21 = vector.broadcast %19 : i32 to vector<8x1xi32>
    %22 = arith.addi %21, %20 : vector<8x1xi32>
    %c8_i32_8 = arith.constant 8 : i32
    %23 = vector.broadcast %c8_i32_8 : i32 to vector<8x1xi32>
    %24 = arith.cmpi slt, %22, %23 : vector<8x1xi32>
    %cst_9 = arith.constant 1.000000e+30 : f32
    %25 = vector.broadcast %cst_9 : f32 to vector<8x128xf32>
    %26 = arith.select %16, %13, %25 : vector<8x128xi1>, vector<8x128xf32>
    %cst_10 = arith.constant dense<0x7F800000> : vector<8xf32>
    %27 = vector.multi_reduction <minimumf>, %26, %cst_10 [1] : vector<8x128xf32> to vector<8xf32>
    %28 = vector.shape_cast %27 : vector<8xf32> to vector<8x1xf32>
    %29 = vector.broadcast %28 : vector<8x1xf32> to vector<8x128xf32>
    %30 = arith.subf %29, %26 : vector<8x128xf32>
    %31 = math.exp %30 : vector<8x128xf32>
    %cst_11 = arith.constant dense<0.000000e+00> : vector<8xf32>
    %32 = vector.multi_reduction <add>, %31, %cst_11 [1] : vector<8x128xf32> to vector<8xf32>
    %33 = vector.shape_cast %32 : vector<8xf32> to vector<8x1xf32>
    %cst_12 = arith.constant 0.000000e+00 : f32
    %34 = vector.broadcast %cst_12 : f32 to vector<8x128xf32>
    %35 = arith.select %16, %13, %34 : vector<8x128xi1>, vector<8x128xf32>
    %cst_13 = arith.constant dense<0.000000e+00> : vector<8xf32>
    %36 = vector.multi_reduction <add>, %35, %cst_13 [1] : vector<8x128xf32> to vector<8xf32>
    %37 = vector.shape_cast %36 : vector<8xf32> to vector<8x1xf32>
    %cst_14 = arith.constant 0.000000e+00 : f32
    %38 = vector.broadcast %cst_14 : f32 to vector<8x128xf32>
    %39 = arith.select %18, %13, %38 : vector<8x128xi1>, vector<8x128xf32>
    %cst_15 = arith.constant dense<0.000000e+00> : vector<8xf32>
    %40 = vector.multi_reduction <add>, %39, %cst_15 [1] : vector<8x128xf32> to vector<8xf32>
    %41 = vector.shape_cast %40 : vector<8xf32> to vector<8x1xf32>
    %cst_16 = arith.constant 0.042857144 : f32
    %42 = vector.broadcast %cst_16 : f32 to vector<8x1xf32>
    %43 = arith.mulf %42, %37 : vector<8x1xf32>
    %cst_17 = arith.constant -0.91785717 : f32
    %44 = vector.broadcast %cst_17 : f32 to vector<8x1xf32>
    %45 = arith.mulf %44, %41 : vector<8x1xf32>
    %46 = arith.addf %43, %45 : vector<8x1xf32>
    %47 = math.log %33 : vector<8x1xf32>
    %48 = arith.subf %47, %28 : vector<8x1xf32>
    %cst_18 = arith.constant -5.750000e-01 : f32
    %49 = vector.broadcast %cst_18 : f32 to vector<8x1xf32>
    %50 = arith.mulf %49, %48 : vector<8x1xf32>
    %51 = arith.addf %46, %50 : vector<8x1xf32>
    %cst_19 = arith.constant 0.000000e+00 : f32
    %52 = vector.broadcast %cst_19 : f32 to vector<8x1xf32>
    %53 = arith.select %24, %51, %52 : vector<8x1xi1>, vector<8x1xf32>
    %54 = vector.shape_cast %53 : vector<8x1xf32> to vector<1x8x1xf32>
    %cst_20 = arith.constant dense<0.000000e+00> : vector<1xf32>
    %55 = vector.multi_reduction <add>, %54, %cst_20 [1, 2] : vector<1x8x1xf32> to vector<1xf32>
    %56 = vector.shape_cast %55 : vector<1xf32> to vector<1x1x1xf32>
    %57 = vector.extract %56[0, 0, 0] : f32 from vector<1x1x1xf32>
    %58 = vector.broadcast %57 : f32 to vector<1x1xf32>
    %cst_21 = arith.constant -1.000000e+30 : f32
    %59 = vector.broadcast %cst_21 : f32 to vector<8x128xf32>
    %60 = arith.select %16, %13, %59 : vector<8x128xi1>, vector<8x128xf32>
    %cst_22 = arith.constant dense<0xFF800000> : vector<8xf32>
    %61 = vector.multi_reduction <maximumf>, %60, %cst_22 [1] : vector<8x128xf32> to vector<8xf32>
    %62 = vector.shape_cast %61 : vector<8xf32> to vector<8x1xf32>
    %63 = vector.broadcast %62 : vector<8x1xf32> to vector<8x128xf32>
    %64 = arith.cmpf oeq, %60, %63 : vector<8x128xf32>
    %c128_i32 = arith.constant 128 : i32
    %65 = vector.broadcast %c128_i32 : i32 to vector<8x128xi32>
    %66 = arith.select %64, %14, %65 : vector<8x128xi1>, vector<8x128xi32>
    %cst_23 = arith.constant dense<2147483647> : vector<8xi32>
    %67 = vector.multi_reduction <minsi>, %66, %cst_23 [1] : vector<8x128xi32> to vector<8xi32>
    %68 = vector.shape_cast %67 : vector<8xi32> to vector<8x1xi32>
    %69 = arith.cmpi eq, %68, %1 : vector<8x1xi32>
    %70 = arith.andi %69, %24 : vector<8x1xi1>
    %cst_24 = arith.constant 1.000000e+00 : f32
    %cst_25 = arith.constant 0.000000e+00 : f32
    %71 = vector.broadcast %cst_24 : f32 to vector<8x1xf32>
    %72 = vector.broadcast %cst_25 : f32 to vector<8x1xf32>
    %73 = arith.select %70, %71, %72 : vector<8x1xi1>, vector<8x1xf32>
    %74 = vector.shape_cast %73 : vector<8x1xf32> to vector<1x8x1xf32>
    %cst_26 = arith.constant dense<0.000000e+00> : vector<1xf32>
    %75 = vector.multi_reduction <add>, %74, %cst_26 [1, 2] : vector<1x8x1xf32> to vector<1xf32>
    %76 = vector.shape_cast %75 : vector<1xf32> to vector<1x1x1xf32>
    %77 = vector.extract %76[0, 0, 0] : f32 from vector<1x1x1xf32>
    %78 = vector.broadcast %77 : f32 to vector<1x1xf32>
    %79 = vector.shape_cast %58 : vector<1x1xf32> to vector<1x1x1xf32>
    %80 = vector.broadcast %79 : vector<1x1x1xf32> to vector<1x8x128xf32>
    %c0_27 = arith.constant 0 : index
    %c0_28 = arith.constant 0 : index
    %c0_29 = arith.constant 0 : index
    %81 = vector.load %arg4[%c0_27, %c0_28, %c0_29] : memref<1x8x128xf32, #tpu.memory_space<vmem>>, vector<1x8x128xf32>
    tpu.vector_store %arg4[%c0_27, %c0_28, %c0_29], %80 {strides = array<i32>} : memref<1x8x128xf32, #tpu.memory_space<vmem>>, vector<1x8x128xf32>,
    %82 = vector.shape_cast %78 : vector<1x1xf32> to vector<1x1x1xf32>
    %83 = vector.broadcast %82 : vector<1x1x1xf32> to vector<1x8x128xf32>
    %c0_30 = arith.constant 0 : index
    %c0_31 = arith.constant 0 : index
    %c0_32 = arith.constant 0 : index
    %84 = vector.load %arg5[%c0_30, %c0_31, %c0_32] : memref<1x8x128xf32, #tpu.memory_space<vmem>>, vector<1x8x128xf32>
    tpu.vector_store %arg5[%c0_30, %c0_31, %c0_32], %83 {strides = array<i32>} : memref<1x8x128xf32, #tpu.memory_space<vmem>>, vector<1x8x128xf32>,
    return
  }
  func.func @transform_0(%arg0: i32) -> (i32, i32) {
    %c0_i32 = arith.constant 0 : i32
    %c0_i32_0 = arith.constant 0 : i32
    return %arg0, %c0_i32 : i32, i32
  }
  func.func @transform_1(%arg0: i32) -> (i32, i32) {
    %c0_i32 = arith.constant 0 : i32
    %c0_i32_0 = arith.constant 0 : i32
    return %arg0, %c0_i32 : i32, i32
  }
  func.func @transform_2(%arg0: i32) -> (i32, i32) {
    %c0_i32 = arith.constant 0 : i32
    %c0_i32_0 = arith.constant 0 : i32
    %c0_i32_1 = arith.constant 0 : i32
    return %c0_i32, %c0_i32_0 : i32, i32
  }
  func.func @transform_3(%arg0: i32) -> (i32, i32, i32) {
    %c0_i32 = arith.constant 0 : i32
    %c0_i32_0 = arith.constant 0 : i32
    %c0_i32_1 = arith.constant 0 : i32
    return %arg0, %c0_i32, %c0_i32_0 : i32, i32, i32
  }
  func.func @transform_4(%arg0: i32) -> (i32, i32, i32) {
    %c0_i32 = arith.constant 0 : i32
    %c0_i32_0 = arith.constant 0 : i32
    %c0_i32_1 = arith.constant 0 : i32
    return %arg0, %c0_i32, %c0_i32_0 : i32, i32, i32
  }
}

</mosaic_0001>

<bundles_post_ra>
// kernel: tpu_custom_call.1
= control target key start
LH: loop header
LB: loop body
LE: loop exit
PB: predicated region body
PF: predicated region fallthrough
CT: control target
= control target key end

     0   :  { %10 = vsyncpa [#allocation3], 0  ;;  %s480_s0 = inlined_call_operand.vmem [shape: bf16[8,128], index: 0, kind: input, shape index: {}]   ;;  %s481_s1 = inlined_call_operand.vmem [shape: s32[8,1], index: 1, kind: input, shape index: {}]   ;;  %s482_s2 = inlined_call_operand.hbm [shape: bf16[128,128], index: 2, kind: input, shape index: {}]   ;;  %s483_s3 = inlined_call_operand.hbm [shape: f32[1,8,128], index: 3, kind: output, shape index: {0}]   ;;  %s484_s4 = inlined_call_operand.hbm [shape: f32[1,8,128], index: 4, kind: output, shape index: {1}]  }
   0x1   :  { %11 = vsyncpa [#allocation4], 0 }
   0x2   :  { %12 = vsyncpa [#allocation7], 0  ;;  %s395_s15 = smov [#allocation2]   ;;  %s323_s19 = scalar_lea.hbm %s482_s2, 1024 }
   0x3   :  { %s22_s16 = sshll.u32 %s395_s15, 4  ;;  %p324_p0 = scmp.ne.s32.totalorder %s482_s2, %s323_s19  ;;  %s23_s16 = int_to_ptr.vmem [resolvable:$true] %s22_s16 }
   0x4   :  { %p327_p1 = scmp.lt.u32.totalorder %s323_s19, %s482_s2 }
   0x6   :  { %p329_p2 = pnand %p327_p1, %p324_p0 }
   0x8   :  { %332 = shalt.err (!%p329_p2)
}
   0x9   :  { %s333_s24 = scalar_lea.vmem %s23_s16, 1024  ;;  %p338_p4 = scmp.lt.s32.totalorder %s23_s16, %s23_s16 }
   0xa   :  { %p334_p3 = scmp.ne.s32.totalorder %s23_s16, %s333_s24  ;;  %p339_p5 = scmp.lt.s32.totalorder %s333_s24, %s333_s24 }
   0xc   :  { %p340_p6 = por %p339_p5, %p338_p4 }
   0xe   :  { %p341_p7 = pnand %p340_p6, %p334_p3 }
  0x10   :  { %344 = shalt.err (!%p341_p7)
}
  0x11   :  { %s396_s25 = smov 64   ;;  %s397_s26 = smov 4  }
  0x12   :  { %28 = dma.hbm_to_vmem [thread:$0]  %s482_s2, 1024, %s23_s16, [#allocation3], %s396_s25, %s396_s25, %s397_s26  }
  0x13   :  { %389 = dma.done.wait [#allocation3], 1024  }
  0x14   :  { %390 = vsyncadd [#allocation3], 4294966272  ;;  %v398_v0 = vmov 0.0   ;;  %v33_v1 = vld [vmem:[%s480_s0] sm:$0xf]  ;;  %v310_v5 = vld [vmem:[#allocation2 + $0x8] sm:$0xff]   ;;  %v147_v18 = vlaneseq }
  0x15   :  { %276 = vmatprep.subr.bf16.mxu0 %v398_v0  ;;  %v35_v2 = vunpack.c.l.bf16 %v33_v1  ;;  %v309_v3 = vld [vmem:[#allocation2] sm:$0xff]   ;;  %v311_v6 = vld [vmem:[#allocation2 + $0x10] sm:$0xff]   ;;  %v312_v7 = vld [vmem:[#allocation2 + $0x18] sm:$0xff]   ;;  %vm399_vm0 = vmmov 0   ;;  %v400_v17 = vmov 0   ;;  %vm183_vm5 = vcmask 7168  }
  0x16   :  { %277 = vmatpush3.bf16.msra.mxu0 %v309_v3  ;;  %v313_v8 = vld [vmem:[#allocation2 + $0x20] sm:$0xff]   ;;  %v314_v9 = vld [vmem:[#allocation2 + $0x28] sm:$0xff]   ;;  %292 = vmatprep.mubr.msk.bf16.mxu0 %vm399_vm0, %v398_v0  ;;  %v315_v10 = vld [vmem:[#allocation2 + $0x30] sm:$0xff]   ;;  %v148_v19 = vand.u32 127, %v147_v18 }
  0x17   :  { %v36_v4 = vmul.f32 %v35_v2, %v35_v2  ;;  %278 = vmatprep.subr.bf16.mxu0 %v398_v0  ;;  %v316_v11 = vld [vmem:[#allocation2 + $0x38] sm:$0xff]   ;;  %308 = vset.pattern.permute.xlu0 %v400_v17  ;;  %v34_v27 = vld [vmem:[%s481_s1] sm:$0xff]  ;;  %s401_s1 = smov [#allocation5]  }
  0x18   :  { %vm149_vm1 = vcmp.lt.s32.totalorder %v148_v19, 8  ;;  %s236_s5 = sshll.u32 %s401_s1, 4  ;;  %s237_s5 = int_to_ptr.vmem [resolvable:$true] %s236_s5 }
  0x19   :  { %37 = vadd.xlane.f32.xlu0 %v36_v4  ;;  %s345_s7 = scalar_lea.vmem %s237_s5, 128  ;;  %p350_p9 = scmp.lt.s32.totalorder %s237_s5, %s237_s5 }
  0x1a   :  { %279 = vmatpush3.bf16.msra.mxu0 %v310_v5  ;;  %p346_p8 = scmp.ne.s32.totalorder %s237_s5, %s345_s7  ;;  %p351_p10 = scmp.lt.s32.totalorder %s345_s7, %s345_s7 }
  0x1b   :  { %280 = vmatprep.subr.bf16.mxu0 %v398_v0 }
  0x1c   :  { %p352_p11 = por %p351_p10, %p350_p9 }
  0x1e   :  { %281 = vmatpush3.bf16.msra.mxu0 %v311_v6  ;;  %p353_p12 = pnand %p352_p11, %p346_p8 }
  0x1f   :  { %282 = vmatprep.subr.bf16.mxu0 %v398_v0 }
  0x22   :  { %283 = vmatpush3.bf16.msra.mxu0 %v312_v7 }
  0x23   :  { %284 = vmatprep.subr.bf16.mxu0 %v398_v0 }
  0x26   :  { %285 = vmatpush3.bf16.msra.mxu0 %v313_v8 }
  0x27   :  { %286 = vmatprep.subr.bf16.mxu0 %v398_v0 }
  0x2a   :  { %287 = vmatpush3.bf16.msra.mxu0 %v314_v9 }
  0x2b   :  { %288 = vmatprep.subr.bf16.mxu0 %v398_v0 }
  0x2e   :  { %289 = vmatpush3.bf16.msra.mxu0 %v315_v10 }
  0x2f   :  { %290 = vmatprep.subr.bf16.mxu0 %v398_v0 }
  0x32   :  { %291 = vmatpush3.bf16.msra.mxu0 %v316_v11 }
  0xa6   :  { %v38_v12 = vpop.xlane.xlu0 %37 }
  0xa7   :  { %v39_v13 = vadd.f32 1e-12, %v38_v12 }
  0xa9   :  { %317 = vrsqrt.f32 %v39_v13 }
  0xb3   :  { %v318_v14 = vpop.eup %317 }
  0xb4   :  { %v41_v15 = vmul.f32 %v318_v14, %v35_v2 }
  0xb6   :  { %v42_v16 = vpack.c.bf16 %v41_v15, %v41_v15 }
  0xb8   :  { %293 = vmatmul.mubr.bf16.vlgmr.msra.gmra.mrb[0].mxu0 %v42_v16 }
 0x18b   :  { %v141_v20 = vpop.f32.mrb[0].mxu0 }
 0x18c   :  { %v294_v21 = vpop.f32.mrb[1].mxu0  ;;  %v194_v22 = vsel %vm149_vm1, %v141_v20, -1e+30  ;;  %v160_v23 = vsel %vm149_vm1, %v141_v20, 1e+30  ;;  %v168_v24 = vsel %vm149_vm1, %v141_v20, 0.0 }
 0x18d   :  { %195 = vmax.xlane.f32.xlu0 %v194_v22  ;;  %161 = vmin.xlane.f32.xlu1 %v160_v23  ;;  %v144_v25 = vpop.f32.mrb[2].mxu0 }
 0x18e   :  { %v295_v26 = vpop.f32.mrb[3].mxu0 }
 0x1a3   :  { %151 = vperm.xlu0 %308, %v34_v27  }
 0x21a   :  { %v196_v28 = vpop.xlane.xlu0 %195  ;;  %v162_v29 = vpop.xlane.xlu1 %161 }
 0x21b   :  { %vm197_vm2 = vcmp.eq.f32.partialorder %v194_v22, %v196_v28  ;;  %v163_v30 = vsub.f32 %v162_v29, %v160_v23 }
 0x21c   :  { %v198_v31 = vsel %vm197_vm2, %v148_v19, 128 }
 0x21d   :  { %v164_v32 = vmul.f32 1.442695, %v163_v30  ;;  %v200_v33 = vshra.s32 %v198_v31, 16  ;;  %v199_v38 = vand.u32 65535, %v198_v31 }
 0x21f   :  { %319 = vpow2.f32 %v164_v32  ;;  %v202_v34 = vcvt.s32.f32 %v200_v33  ;;  %v201_v40 = vcvt.s32.f32 %v199_v38 }
 0x221   :  { %203 = vmin.xlane.f32.xlu1 %v202_v34 }
 0x222   :  { %v152_v36 = vpop.permute.xlu0 %151 }
 0x223   :  { %vm153_vm3 = vcmp.eq.s32.totalorder %v148_v19, %v152_v36 }
 0x224   :  { %v171_v37 = vsel %vm153_vm3, %v141_v20, 0.0 }
 0x229   :  { %v320_v35 = vpop.eup %319 }
 0x22a   :  { %166 = vadd.xlane.f32.xlu1 %v320_v35 }
 0x22e   :  { %169 = vadd.xlane.f32.xlu1 %v168_v24 }
 0x232   :  { %172 = vadd.xlane.f32.xlu1 %v171_v37 }
 0x2ae   :  { %v204_v39 = vpop.xlane.xlu1 %203 }
 0x2af   :  { %vm205_vm4 = vcmp.eq.f32.partialorder %v202_v34, %v204_v39  ;;  %v210_v54 = vcvt.f32.s32 %v204_v39 }
 0x2b0   :  { %v206_v41 = vsel %vm205_vm4, %v201_v40, inf }
 0x2b1   :  { %207 = vmin.xlane.f32.xlu1 %v206_v41  ;;  %v211_v56 = vshll.u32 %v210_v54, 16 }
 0x2b7   :  { %v167_v42 = vpop.xlane.xlu1 %166 }
 0x2b8   :  { %321 = vlog2.f32 %v167_v42 }
 0x2bb   :  { %v170_v43 = vpop.xlane.xlu1 %169 }
 0x2bc   :  { %v174_v48 = vmul.f32 0.042857144, %v170_v43 }
 0x2bf   :  { %v173_v44 = vpop.xlane.xlu1 %172 }
 0x2c0   :  { %v175_v47 = vmul.f32 -0.91785717, %v173_v44 }
 0x2c2   :  { %v322_v45 = vpop.eup %321  ;;  %v176_v50 = vadd.f32 %v175_v47, %v174_v48 }
 0x2c3   :  { %v178_v46 = vmul.f32 0.6931472, %v322_v45 }
 0x2c5   :  { %v179_v49 = vsub.f32 %v178_v46, %v162_v29 }
 0x2c7   :  { %v180_v51 = vmul.f32 -0.575, %v179_v49 }
 0x2c9   :  { %v181_v52 = vadd.f32 %v180_v51, %v176_v50 }
 0x2cb   :  { %v184_v53 = vsel %vm183_vm5, %v181_v52, 0.0 }
 0x2cc   :  { %185 = vadd.xlane.f32.xlu1 %v184_v53 }
 0x33e   :  { %v208_v55 = vpop.xlane.xlu1 %207 }
 0x33f   :  { %v209_v57 = vcvt.f32.s32 %v208_v55 }
 0x341   :  { %v212_v58 = vadd.s32 %v211_v56, %v209_v57 }
 0x343   :  { %vm213_vm6 = vcmp.eq.s32.totalorder %v212_v58, %v34_v27 }
 0x344   :  { %v215_v59 = vsel %vm213_vm6, 1.0, %v398_v0 }
 0x345   :  { %v216_v60 = vsel %vm183_vm5, %v215_v59, 0.0 }
 0x346   :  { %217 = vadd.xlane.f32.xlu1 %v216_v60 }
 0x359   :  { %v186_v61 = vpop.xlane.xlu1 %185 }
 0x35a   :  { %v187_v62 = vrot.slane %v186_v61, 4 }
 0x35c   :  { %v188_v63 = vadd.f32 %v187_v62, %v186_v61 }
 0x35e   :  { %v189_v1 = vrot.slane %v188_v63, 2 }
 0x360   :  { %v190_v2 = vadd.f32 %v189_v1, %v188_v63 }
 0x362   :  { %v191_v3 = vrot.slane %v190_v2, 1 }
 0x364   :  { %v192_v4 = vadd.f32 %v191_v3, %v190_v2 }
 0x366   :  { %296 = vpush %v192_v4 }
 0x397   :  { %s297_s6 = spop %296 }
 0x398   :  { %v226_v5 = vstv %s297_s6 }
 0x399   :  { %227 = vst [vmem:[#allocation5] sm:$0xff] %v226_v5 }
 0x39a   :  { %356 = shalt.err (!%p353_p12)
}
 0x39b   :  { %s357_s10 = scalar_lea.hbm %s483_s3, 128 }
 0x39c   :  { %p358_p13 = scmp.ne.s32.totalorder %s483_s3, %s357_s10  ;;  %p361_p0 = scmp.lt.u32.totalorder %s357_s10, %s483_s3 }
 0x39e   :  { %p363_p1 = pnand %p361_p0, %p358_p13 }
 0x3a0   :  { %366 = shalt.err (!%p363_p1)
}
 0x3a1   :  { %239 = dma.vmem_to_hbm [thread:$0]  %s237_s5, 128, %s483_s3, [#allocation4]  }
 0x3a2   :  { %s402_s17 = smov [#allocation6]  }
 0x3a3   :  { %s246_s18 = sshll.u32 %s402_s17, 4  ;;  %s247_s18 = int_to_ptr.vmem [resolvable:$true] %s246_s18 }
 0x3a4   :  { %s367_s20 = scalar_lea.vmem %s247_s18, 128  ;;  %p372_p3 = scmp.lt.s32.totalorder %s247_s18, %s247_s18 }
 0x3a5   :  { %p368_p2 = scmp.ne.s32.totalorder %s247_s18, %s367_s20  ;;  %p373_p4 = scmp.lt.s32.totalorder %s367_s20, %s367_s20 }
 0x3a7   :  { %p374_p5 = por %p373_p4, %p372_p3 }
 0x3a9   :  { %p375_p6 = pnand %p374_p5, %p368_p2 }
 0x3d3   :  { %v218_v0 = vpop.xlane.xlu1 %217 }
 0x3d4   :  { %v219_v6 = vrot.slane %v218_v0, 4 }
 0x3d6   :  { %v220_v7 = vadd.f32 %v219_v6, %v218_v0 }
 0x3d8   :  { %v221_v8 = vrot.slane %v220_v7, 2 }
 0x3da   :  { %v222_v9 = vadd.f32 %v221_v8, %v220_v7 }
 0x3dc   :  { %v223_v10 = vrot.slane %v222_v9, 1 }
 0x3de   :  { %v224_v11 = vadd.f32 %v223_v10, %v222_v9 }
 0x3e0   :  { %298 = vpush %v224_v11 }
 0x411   :  { %s299_s19 = spop %298 }
 0x412   :  { %v228_v12 = vstv %s299_s19 }
 0x413   :  { %229 = vst [vmem:[#allocation6] sm:$0xff] %v228_v12 }
 0x414   :  { %378 = shalt.err (!%p375_p6)
}
 0x415   :  { %s379_s22 = scalar_lea.hbm %s484_s4, 128 }
 0x416   :  { %p380_p7 = scmp.ne.s32.totalorder %s484_s4, %s379_s22  ;;  %p383_p8 = scmp.lt.u32.totalorder %s379_s22, %s484_s4 }
 0x418   :  { %p385_p9 = pnand %p383_p8, %p380_p7 }
 0x41a   :  { %388 = shalt.err (!%p385_p9)
}
 0x41b   :  { %249 = dma.vmem_to_hbm [thread:$0]  %s247_s18, 128, %s484_s4, [#allocation7]  }
 0x41c   :  { %391 = dma.done.wait [#allocation4], 128  }
 0x41d   :  { %392 = vsyncadd [#allocation4], 4294967168 }
 0x41e   :  { %393 = dma.done.wait [#allocation7], 128  }
 0x41f   :  { %394 = vsyncadd [#allocation7], 4294967168 }
 0x420   :  { %256 = vsyncpa [#allocation3], 1 }
 0x421   :  { %257 = vsyncpa [#allocation4], 1 }
 0x422   :  { %258 = vsyncpa [#allocation7], 1 }

</bundles_post_ra>
